<compile_context>
chip_gen: v5e
topology: v5e:2x2
jax: 0.10.0
libtpu: 0.0.40
codegen_flags: <defaults>
</compile_context>

<pallas_src>
import jax
import jax.numpy as jnp
from jax import lax
from jax.experimental import pallas as pl
from jax.experimental.pallas import tpu as pltpu

_INV_SQRT2 = 0.7071067811865476  # 1/sqrt(2)


def _make_kernel(nb, cin, apply_gelu, gelu_approximate, use_mxu):
    def _act(y):
        if not apply_gelu:
            return y
        if gelu_approximate:
            # tanh-based GELU: transcendental goes to the EUP slot (v7x lever).
            return jax.nn.gelu(y, approximate=True)
        # exact GELU (torch nn.GELU default, approximate='none')
        return 0.5 * y * (1.0 + lax.erf(y * _INV_SQRT2))

    if use_mxu:
        def kernel(x_ref, w_ref, b_ref, o_ref):
            # x_ref: (nb, Cin, T)  w_ref: (Cout, Cin)  b_ref: (Cout, 1)
            # o_ref: (nb, Cout, T)
            w = w_ref[...]
            b = b_ref[...]
            for bi in range(nb):  # static unroll; nb is kept small on this path
                y = jnp.dot(w, x_ref[bi], preferred_element_type=jnp.float32)
                o_ref[bi] = _act(y + b).astype(o_ref.dtype)
    else:
        def kernel(x_ref, w_ref, b_ref, o_ref):
            # Tiny channel counts: MXU would be <1% utilized, so do an unrolled
            # VPU broadcast-FMA over Cin instead.
            # x_ref: (nb, Cin, T)  w_ref: (Cin, Cout, 1)  b_ref: (Cout, 1)
            x = x_ref[...]
            b = b_ref[...]
            y = w_ref[0][None] * x[:, 0:1, :]      # (1,Cout,1)*(nb,1,T)->(nb,Cout,T)
            for c in range(1, cin):
                y = y + w_ref[c][None] * x[:, c:c + 1, :]
            o_ref[...] = _act(y + b[None]).astype(o_ref.dtype)

    return kernel


def conv_block_forward(x_nchw, weight, bias, *, apply_gelu=True,
                       gelu_approximate=False, target_step_bytes=8 << 20):
    """1x1 Conv2d (+ optional GELU) matching torch ConvBlock.forward.

    x_nchw: (N, Cin, H, W) f32
    weight: (Cout, Cin, 1, 1) f32   (torch Conv2d layout)
    bias:   (Cout,) f32
    returns (N, Cout, H, W) f32
    """
    N, Cin, H, W = x_nchw.shape
    Cout = weight.shape[0]
    HW = H * W

    # Free, contiguous reshapes — no transposes / pads / extra HBM passes.
    x_flat = x_nchw.reshape(N, Cin, HW)
    w_mat = weight.reshape(Cout, Cin)
    b_col = bias.reshape(Cout, 1)

    # ---- chip-aware VMEM budget (v7x: 64 MiB; v5e/v6e: 128 MiB) -------------
    try:
        phys_vmem = int(pltpu.get_tpu_info().vmem_capacity_bytes)
    except Exception:
        phys_vmem = 64 << 20          # conservative fallback (v7x-sized)
    vmem_budget = phys_vmem // 2      # headroom for weights + compiler scratch

    elem = 4                                   # f32
    per_lane_bytes = (Cin + Cout) * elem       # in + out traffic per lane column
    small_channels = (Cin <= 8) and (Cout <= 16)

    # ---- lane tile over H*W: as big as target / VMEM allow, multiple of 128 --
    if HW < 128:
        t = HW                                 # block dim == full array dim
    else:
        t_max_hw = (HW // 128) * 128
        t_target = max(128, (target_step_bytes // per_lane_bytes // 128) * 128)
        t_vmem = max(128, (vmem_budget // (2 * per_lane_bytes) // 128) * 128)
        t = max(128, min(t_max_hw, t_target, t_vmem))

    # ---- pack several batch images per step when a single image is tiny -----
    step_bytes = per_lane_bytes * t
    nb = 1
    if N > 1 and step_bytes < target_step_bytes:
        nb_cap = 256 if small_channels else 32   # MXU path statically unrolls nb
        nb = min(N, nb_cap, max(1, int(target_step_bytes // max(step_bytes, 1))))
        nb_vmem = max(1, int(vmem_budget // (2 * per_lane_bytes * t)))
        nb = max(1, min(nb, nb_vmem))

    # ---- keep >= 2 grid steps when possible (v7x has 2 TensorCores/chip) ----
    def _nsteps(nb_, t_):
        return pl.cdiv(N, nb_) * pl.cdiv(HW, t_)

    if _nsteps(nb, t) < 2:
        if nb > 1:
            nb = (nb + 1) // 2
        if _nsteps(nb, t) < 2 and HW >= 256 and t >= 256:
            t = max(128, ((t // 2) // 128) * 128)

    grid = (pl.cdiv(N, nb), pl.cdiv(HW, t))

    # ---- specs / compiler params ---------------------------------------------
    if small_channels:
        # weight columns: w_arg[c] == weight[:, c] as a (Cout, 1) column, so the
        # kernel never lane-slices inside the loop.
        w_arg = jnp.transpose(w_mat).reshape(Cin, Cout, 1)
        w_spec = pl.BlockSpec((Cin, Cout, 1), lambda bi, j: (0, 0, 0))
    else:
        w_arg = w_mat
        w_spec = pl.BlockSpec((Cout, Cin), lambda bi, j: (0, 0))

    # double-buffered x + out, plus weight/bias; give the compiler 2x slack.
    footprint = 2 * nb * per_lane_bytes * t + 8 * (Cout * Cin + Cout) * elem
    vmem_limit = int(min(phys_vmem * 3 // 4, max(2 * footprint, 32 << 20)))

    kernel = _make_kernel(nb, Cin, apply_gelu, gelu_approximate,
                          use_mxu=not small_channels)

    out_flat = pl.pallas_call(
        kernel,
        out_shape=jax.ShapeDtypeStruct((N, Cout, HW), jnp.float32),
        grid=grid,
        in_specs=[
            # x tile: (nb, Cin, t) with the big H*W axis lane-dense.
            pl.BlockSpec((nb, Cin, t), lambda bi, j: (bi, 0, j)),
            # weight + bias: resident across the whole grid.
            w_spec,
            pl.BlockSpec((Cout, 1), lambda bi, j: (0, 0)),
        ],
        out_specs=pl.BlockSpec((nb, Cout, t), lambda bi, j: (bi, 0, j)),
        compiler_params=pltpu.CompilerParams(
            # both grid axes independent -> megacore sharding on v7x
            dimension_semantics=("parallel", "parallel"),
            vmem_limit_bytes=vmem_limit,
        ),
    )(x_flat, w_arg, b_col)

    # NOTE: partial last HW tile (HW % t != 0) reads padded garbage through the
    # GELU before the clipped store — benign on TPU (no FP traps, OOB writes
    # dropped), just visible in profiles.
    return out_flat.reshape(N, Cout, H, W)


def _reference(x_nchw, weight, bias, apply_gelu=True, gelu_approximate=False):
    # pure-JAX reference (exact f32 contraction) for correctness checks
    Cout, Cin = weight.shape[0], weight.shape[1]
    y = jnp.einsum("nchw,oc->nohw", x_nchw, weight.reshape(Cout, Cin),
                   precision="highest")
    y = y + bias[None, :, None, None]
    if apply_gelu:
        y = jax.nn.gelu(y, approximate=gelu_approximate)
    return y


if __name__ == "__main__":
    key = jax.random.PRNGKey(0)
    k_x, k_w, k_b, k_x2, k_w2, k_b2 = jax.random.split(key, 6)

    # --- ConvBlock(4, 8) defaults: kernel_size=1, padding=0, act_func='GELU' --
    N, Cin, H, W = 2, 4, 16, 16
    Cout = 8
    x = jax.random.normal(k_x, (N, Cin, H, W), dtype=jnp.float32)
    bound = 1.0 / jnp.sqrt(Cin)
    weight = jax.random.uniform(k_w, (Cout, Cin, 1, 1), jnp.float32, -bound, bound)
    bias = jax.random.uniform(k_b, (Cout,), jnp.float32, -bound, bound)

    out = jax.block_until_ready(conv_block_forward(x, weight, bias))
    assert out.shape == (N, Cout, H, W)
    assert jnp.allclose(out, _reference(x, weight, bias),
                        atol=1e-5, rtol=1e-5), "GELU path mismatch vs reference"

    # act_func=None path
    out_na = jax.block_until_ready(conv_block_forward(x, weight, bias,
                                                      apply_gelu=False))
    assert jnp.allclose(out_na, _reference(x, weight, bias, apply_gelu=False),
                        atol=1e-5, rtol=1e-5), "no-act path mismatch vs reference"

    # tanh-approx GELU path (v7x lever; compared against tanh-GELU reference)
    out_ap = jax.block_until_ready(
        conv_block_forward(x, weight, bias, gelu_approximate=True))
    assert jnp.allclose(out_ap, _reference(x, weight, bias, gelu_approximate=True),
                        atol=1e-5, rtol=1e-5), "approx-GELU path mismatch"

    # --- larger channel count exercises the MXU path --------------------------
    Cin2, Cout2 = 32, 64
    x2 = jax.random.normal(k_x2, (N, Cin2, H, W), dtype=jnp.float32)
    bound2 = 1.0 / jnp.sqrt(Cin2)
    w2 = jax.random.uniform(k_w2, (Cout2, Cin2, 1, 1), jnp.float32, -bound2, bound2)
    b2 = jax.random.uniform(k_b2, (Cout2,), jnp.float32, -bound2, bound2)
    out2 = jax.block_until_ready(conv_block_forward(x2, w2, b2))
    # looser tolerance: MXU pass accumulation order differs from XLA reference
    assert jnp.allclose(out2, _reference(x2, w2, b2),
                        atol=2e-3, rtol=2e-3), "MXU path mismatch vs reference"

    # TODO(synk): kernel_size>1 / padding>0 (general spatial conv) is not
    # implemented; the ConvBlock default (1x1, pad=0) is handled exactly.

    print("KERNEL_OK")
</pallas_src>

<mosaic_0001>
module attributes {stable_mosaic.version = 11 : i64} {
  func.func @kernel(%arg0: i32, %arg1: i32, %arg2: memref<1x4x256xf32, #tpu.memory_space<vmem>>, %arg3: memref<4x8x1xf32, #tpu.memory_space<vmem>>, %arg4: memref<8x1xf32, #tpu.memory_space<vmem>>, %arg5: memref<1x8x256xf32, #tpu.memory_space<vmem>>) attributes {dimension_semantics = [#tpu.dimension_semantics<parallel>, #tpu.dimension_semantics<parallel>], iteration_bounds = array<i64: 2, 1>, scalar_prefetch = 0 : i64, scratch_operands = 0 : i64, tpu.core_type = #tpu.core_type<tc>, window_params = [{transform_indices = @transform_0, window_bounds = array<i64: 1, 4, 256>}, {pipeline_mode = #tpu.pipeline_mode<synchronous>, transform_indices = @transform_1, window_bounds = array<i64: 4, 8, 1>}, {pipeline_mode = #tpu.pipeline_mode<synchronous>, transform_indices = @transform_2, window_bounds = array<i64: 8, 1>}, {transform_indices = @transform_3, window_bounds = array<i64: 1, 8, 256>}]} {
    %c0 = arith.constant 0 : index
    %c0_0 = arith.constant 0 : index
    %c0_1 = arith.constant 0 : index
    %0 = vector.load %arg2[%c0, %c0_0, %c0_1] : memref<1x4x256xf32, #tpu.memory_space<vmem>>, vector<1x4x256xf32>
    %c0_2 = arith.constant 0 : index
    %c0_3 = arith.constant 0 : index
    %1 = vector.load %arg4[%c0_2, %c0_3] : memref<8x1xf32, #tpu.memory_space<vmem>>, vector<8x1xf32>
    %c0_4 = arith.constant 0 : index
    %c0_5 = arith.constant 0 : index
    %c0_6 = arith.constant 0 : index
    %2 = vector.load %arg3[%c0_4, %c0_5, %c0_6] : memref<4x8x1xf32, #tpu.memory_space<vmem>>, vector<1x8x1xf32>
    %3 = vector.shape_cast %2 : vector<1x8x1xf32> to vector<8x1xf32>
    %4 = vector.shape_cast %3 : vector<8x1xf32> to vector<1x8x1xf32>
    %5 = vector.extract_strided_slice %0 {offsets = [0, 0, 0], sizes = [1, 1, 256], strides = [1, 1, 1]} : vector<1x4x256xf32> to vector<1x1x256xf32>
    %6 = vector.broadcast %4 : vector<1x8x1xf32> to vector<1x8x256xf32>
    %7 = vector.broadcast %5 : vector<1x1x256xf32> to vector<1x8x256xf32>
    %8 = arith.mulf %6, %7 : vector<1x8x256xf32>
    %c1 = arith.constant 1 : index
    %c0_7 = arith.constant 0 : index
    %c0_8 = arith.constant 0 : index
    %9 = vector.load %arg3[%c1, %c0_7, %c0_8] : memref<4x8x1xf32, #tpu.memory_space<vmem>>, vector<1x8x1xf32>
    %10 = vector.shape_cast %9 : vector<1x8x1xf32> to vector<8x1xf32>
    %11 = vector.shape_cast %10 : vector<8x1xf32> to vector<1x8x1xf32>
    %12 = vector.extract_strided_slice %0 {offsets = [0, 1, 0], sizes = [1, 1, 256], strides = [1, 1, 1]} : vector<1x4x256xf32> to vector<1x1x256xf32>
    %13 = vector.broadcast %11 : vector<1x8x1xf32> to vector<1x8x256xf32>
    %14 = vector.broadcast %12 : vector<1x1x256xf32> to vector<1x8x256xf32>
    %15 = arith.mulf %13, %14 : vector<1x8x256xf32>
    %16 = arith.addf %8, %15 : vector<1x8x256xf32>
    %c2 = arith.constant 2 : index
    %c0_9 = arith.constant 0 : index
    %c0_10 = arith.constant 0 : index
    %17 = vector.load %arg3[%c2, %c0_9, %c0_10] : memref<4x8x1xf32, #tpu.memory_space<vmem>>, vector<1x8x1xf32>
    %18 = vector.shape_cast %17 : vector<1x8x1xf32> to vector<8x1xf32>
    %19 = vector.shape_cast %18 : vector<8x1xf32> to vector<1x8x1xf32>
    %20 = vector.extract_strided_slice %0 {offsets = [0, 2, 0], sizes = [1, 1, 256], strides = [1, 1, 1]} : vector<1x4x256xf32> to vector<1x1x256xf32>
    %21 = vector.broadcast %19 : vector<1x8x1xf32> to vector<1x8x256xf32>
    %22 = vector.broadcast %20 : vector<1x1x256xf32> to vector<1x8x256xf32>
    %23 = arith.mulf %21, %22 : vector<1x8x256xf32>
    %24 = arith.addf %16, %23 : vector<1x8x256xf32>
    %c3 = arith.constant 3 : index
    %c0_11 = arith.constant 0 : index
    %c0_12 = arith.constant 0 : index
    %25 = vector.load %arg3[%c3, %c0_11, %c0_12] : memref<4x8x1xf32, #tpu.memory_space<vmem>>, vector<1x8x1xf32>
    %26 = vector.shape_cast %25 : vector<1x8x1xf32> to vector<8x1xf32>
    %27 = vector.shape_cast %26 : vector<8x1xf32> to vector<1x8x1xf32>
    %28 = vector.extract_strided_slice %0 {offsets = [0, 3, 0], sizes = [1, 1, 256], strides = [1, 1, 1]} : vector<1x4x256xf32> to vector<1x1x256xf32>
    %29 = vector.broadcast %27 : vector<1x8x1xf32> to vector<1x8x256xf32>
    %30 = vector.broadcast %28 : vector<1x1x256xf32> to vector<1x8x256xf32>
    %31 = arith.mulf %29, %30 : vector<1x8x256xf32>
    %32 = arith.addf %24, %31 : vector<1x8x256xf32>
    %33 = vector.shape_cast %1 : vector<8x1xf32> to vector<1x8x1xf32>
    %34 = vector.broadcast %33 : vector<1x8x1xf32> to vector<1x8x256xf32>
    %35 = arith.addf %32, %34 : vector<1x8x256xf32>
    %cst = arith.constant 5.000000e-01 : f32
    %36 = vector.broadcast %cst : f32 to vector<1x8x256xf32>
    %37 = arith.mulf %36, %35 : vector<1x8x256xf32>
    %cst_13 = arith.constant 0.707106769 : f32
    %38 = vector.broadcast %cst_13 : f32 to vector<1x8x256xf32>
    %39 = arith.mulf %35, %38 : vector<1x8x256xf32>
    %40 = math.erf %39 : vector<1x8x256xf32>
    %cst_14 = arith.constant 1.000000e+00 : f32
    %41 = vector.broadcast %cst_14 : f32 to vector<1x8x256xf32>
    %42 = arith.addf %41, %40 : vector<1x8x256xf32>
    %43 = arith.mulf %37, %42 : vector<1x8x256xf32>
    %c0_15 = arith.constant 0 : index
    %c0_16 = arith.constant 0 : index
    %c0_17 = arith.constant 0 : index
    %44 = vector.load %arg5[%c0_15, %c0_16, %c0_17] : memref<1x8x256xf32, #tpu.memory_space<vmem>>, vector<1x8x256xf32>
    tpu.vector_store %arg5[%c0_15, %c0_16, %c0_17], %43 {strides = array<i32>} : memref<1x8x256xf32, #tpu.memory_space<vmem>>, vector<1x8x256xf32>,
    return
  }
  func.func @transform_0(%arg0: i32, %arg1: i32) -> (i32, i32, i32) {
    %c0_i32 = arith.constant 0 : i32
    %c0_i32_0 = arith.constant 0 : i32
    return %arg0, %c0_i32, %arg1 : i32, i32, i32
  }
  func.func @transform_1(%arg0: i32, %arg1: i32) -> (i32, i32, i32) {
    %c0_i32 = arith.constant 0 : i32
    %c0_i32_0 = arith.constant 0 : i32
    %c0_i32_1 = arith.constant 0 : i32
    %c0_i32_2 = arith.constant 0 : i32
    return %c0_i32, %c0_i32_0, %c0_i32_1 : i32, i32, i32
  }
  func.func @transform_2(%arg0: i32, %arg1: i32) -> (i32, i32) {
    %c0_i32 = arith.constant 0 : i32
    %c0_i32_0 = arith.constant 0 : i32
    %c0_i32_1 = arith.constant 0 : i32
    return %c0_i32, %c0_i32_0 : i32, i32
  }
  func.func @transform_3(%arg0: i32, %arg1: i32) -> (i32, i32, i32) {
    %c0_i32 = arith.constant 0 : i32
    %c0_i32_0 = arith.constant 0 : i32
    return %arg0, %c0_i32, %arg1 : i32, i32, i32
  }
}

</mosaic_0001>

<bundles_post_ra>
// kernel: tpu_custom_call.1
= control target key start
LH: loop header
LB: loop body
LE: loop exit
PB: predicated region body
PF: predicated region fallthrough
CT: control target
= control target key end

     0   :  { %8 = vsyncpa [#allocation3], 0  ;;  %s778_s0 = inlined_call_operand.vmem [shape: f32[2,4,256], index: 0, kind: input, shape index: {}]   ;;  %s779_s1 = inlined_call_operand.vmem [shape: f32[4,8,1], index: 1, kind: input, shape index: {}]   ;;  %s780_s2 = inlined_call_operand.vmem [shape: f32[8,1], index: 2, kind: input, shape index: {}]   ;;  %s781_s3 = inlined_call_operand.hbm [shape: f32[2,8,256], index: 3, kind: output, shape index: {}]  }
   0x1   :  { %10 = vsyncpa [#allocation3 + $0x1], 0  ;;  %s644_s12 = smov 0   ;;  %s646_s13 = smov 0  }
   0x2   :  { %s648_s14 = smov 0   ;;  %s650_s15 = smov 0  }
   0x3   :  { %s652_s16 = smov 0   ;;  %s654_s17 = smov 0  }
   0x4 LB: > { %s460_s18 = sadd.s32 4294967295, %s621_s17   ;;  %s461_s19 = sadd.s32 4294967294, %s621_s17   ;;  %s621_s17 = sphi %s654_s17, %s16_s17   ;;  %s617_s16 = sphi %s652_s16, %s788_s16   ;;  %s613_s15 = sphi %s650_s15, %s787_s15   ;;  %s609_s14 = sphi %s648_s14, %s786_s14   ;;  %s605_s13 = sphi %s646_s13, %s785_s13   ;;  %s601_s12 = sphi %s644_s12, %s784_s12  }
   0x5   : > { %s28_s20 = sadd.s32 1, %s617_s16  ;;  %s107_s21 = sadd.s32 1, %s609_s14 }
   0x6   : > { %p30_p0 = scmp.ge.s32.totalorder %s28_s20, 2  ;;  %p117_p1 = scmp.ne.s32.totalorder %s609_s14, %s605_s13 }
   0x7   : > { %p118_p2 = scmp.eq.s32.totalorder %s460_s18, 1  ;;  %p123_p3 = scmp.ne.s32.totalorder %s605_s13, %s601_s12 }
   0x8   : > { %s790_s20 = smov (%p30_p0, %s28_s20), 0  ;;  %p124_p5 = scmp.eq.s32.totalorder %s461_s19, 1 }
   0x9   : > { %p684_p4 = por %p118_p2, %p117_p1  ;;  %s102_s23 = ssub.s32 %s617_s16, %s790_s20 }
   0xa   : > { %p464_p6 = scmp.ge.s32.totalorder %s621_s17, 1  ;;  %p105_p7 = scmp.eq.s32.totalorder %s102_s23, 0 }
   0xb   : > { %p691_p8 = por %p124_p5, %p123_p3  ;;  %p161_p9 = scmp.lt.s32.totalorder %s621_s17, 3 }
   0xc   : > { %s697_s25 = scalar_select %p105_p7, %s609_s14, %s107_s21  }
   0xd   : > { %p162_p10 = pnand %p464_p6, %p161_p9 }
   0xe   : > { %p190_p11 = scmp.lt.s32.totalorder (!%p162_p10), %s613_s15, 1  ;;  %s186_s21 = sand.u32 (!%p162_p10), 1, %s605_s13  }
   0xf   : > { %165 = sbr.rel (%p162_p10) target bundleno = 210 (0xd2), region = 32  ;;  %s465_s23 = sshll.u32 (!%p162_p10), %s186_s21, 4 }
  0x10   : > { %s479_s26 = sshll.u32 (!%p162_p10), %s613_s15, 4  ;;  %s188_s30 = scalar_lea.vmem (!%p162_p10), [#allocation2], %s465_s23 }
  0x11   : > { %s379_s29 = scalar_lea.hbm (!%p162_p10), %s781_s3, %s479_s26  ;;  %s366_s5 = scalar_lea.sflag (!%p162_p10), [#allocation3], %s186_s21 }
  0x12   : > { %s383_s4 = sshll.u32 (!%p162_p10), %s379_s29, 4  ;;  %s384_s4 = int_to_ptr.hbm [resolvable:$true] %s383_s4 }
  0x13   : > { %s557_s6 = sshra.s32 (!%p162_p10), %s384_s4, 4  ;;  %s558_s6 = int_to_ptr.hbm [resolvable:$true] %s557_s6 }
  0x14   : > { %v469_v0 = vld [vmem:[%s779_s1 + $0x10] sm:$0xff]  ;;  %v202_v1 = vld [vmem:[%s779_s1] sm:$0xff]  ;;  %v623_v2 = vmov 0   ;;  %v470_v4 = vld [vmem:[%s779_s1 + $0x18] sm:$0xff]  ;;  %s191_s9 = scalar_select %p190_p11, %s613_s15, 1 }
  0x15   : > { %537 = vset.pattern.permute.xlu1 %v623_v2  ;;  %536 = vset.pattern.permute.xlu0 %v623_v2  ;;  %v201_v3 = vld [vmem:[%s780_s2] sm:$0xff]  ;;  %v468_v5 = vld [vmem:[%s779_s1 + $0x8] sm:$0xff]  ;;  %s381_s15 = sshll.u32 %s188_s30, 4  ;;  %s559_s7 = scalar_lea.hbm %s558_s6, 16  ;;  %s382_s15 = int_to_ptr.vmem [resolvable:$true] %s381_s15 }
  0x16   : > { %238 = vperm.xlu1 %537, %v469_v0   ;;  %205 = vperm.xlu0 %536, %v202_v1   ;;  %s478_s10 = sshll.u32 %s191_s9, 3  ;;  %p560_p12 = scmp.ne.s32.totalorder %s558_s6, %s559_s7 }
  0x17   : > { %538 = vset.pattern.permute.xlu2 %v623_v2  ;;  %s197_s19 = scalar_lea.vmem %s778_s0, %s478_s10  ;;  %s563_s10 = scalar_lea.hbm %s781_s3, 32 }
  0x18   : > { %270 = vperm.xlu2 %538, %v201_v3   ;;  %v200_v6 = vld [vmem:[%s197_s19] sm:$0xff]  ;;  %p561_p13 = pnand %p560_p12, %p684_p4  ;;  %p564_p1 = scmp.lt.s32.totalorder %s558_s6, %s781_s3 }
  0x19   : > { %v209_v9 = vperm.slane %v200_v6, 0  ;;  %v210_v10 = vperm.slane %v200_v6, 4  ;;  %v224_v11 = vperm.slane %v200_v6, 1  ;;  %v225_v12 = vperm.slane %v200_v6, 5  ;;  %p565_p2 = scmp.lt.s32.totalorder %s563_s10, %s559_s7 }
  0x1a   : > { %v241_v13 = vperm.slane %v200_v6, 2  ;;  %v242_v14 = vperm.slane %v200_v6, 6  ;;  %v258_v15 = vperm.slane %v200_v6, 3  ;;  %v259_v16 = vperm.slane %v200_v6, 7  ;;  %p562_p0 = pneg %p561_p13 }
  0x1b   : > { %v213_v17 = vperm.slane %v209_v9, 0  ;;  %v214_v18 = vperm.slane %v210_v10, 0  ;;  %v228_v19 = vperm.slane %v224_v11, 1  ;;  %v229_v20 = vperm.slane %v225_v12, 1  ;;  %p566_p3 = por %p565_p2, %p564_p1 }
  0x1c   : > { %v245_v21 = vperm.slane %v241_v13, 2  ;;  %v246_v22 = vperm.slane %v242_v14, 2  ;;  %v262_v23 = vperm.slane %v258_v15, 3  ;;  %v263_v24 = vperm.slane %v259_v16, 3 }
  0x1d   : > { %p567_p5 = pnand %p566_p3, %p562_p0 }
  0x1e   : > { %255 = vperm.xlu1 %537, %v470_v4   ;;  %221 = vperm.xlu0 %536, %v468_v5  }
  0x72   : > { %v271_v39 = vpop.permute.xlu2 %270 }
  0x88   : > { %v239_v7 = vpop.permute.xlu1 %238  ;;  %v206_v8 = vpop.permute.xlu0 %205 }
  0x89   : > { %v215_v26 = vmul.f32 %v213_v17, %v206_v8  ;;  %v216_v27 = vmul.f32 %v214_v18, %v206_v8  ;;  %v247_v31 = vmul.f32 %v245_v21, %v239_v7  ;;  %v248_v32 = vmul.f32 %v246_v22, %v239_v7 }
  0x90   : > { %v222_v25 = vpop.permute.xlu0 %221  ;;  %v256_v30 = vpop.permute.xlu1 %255 }
  0x91   : > { %v230_v28 = vmul.f32 %v228_v19, %v222_v25  ;;  %v231_v29 = vmul.f32 %v229_v20, %v222_v25  ;;  %v264_v35 = vmul.f32 %v262_v23, %v256_v30  ;;  %v265_v36 = vmul.f32 %v263_v24, %v256_v30 }
  0x93   : > { %v232_v33 = vadd.f32 %v230_v28, %v215_v26  ;;  %v233_v34 = vadd.f32 %v231_v29, %v216_v27 }
  0x95   : > { %v249_v37 = vadd.f32 %v247_v31, %v232_v33  ;;  %v250_v38 = vadd.f32 %v248_v32, %v233_v34 }
  0x97   : > { %v266_v40 = vadd.f32 %v264_v35, %v249_v37  ;;  %v267_v41 = vadd.f32 %v265_v36, %v250_v38 }
  0x99   : > { %v719_v42 = vadd.f32 %v271_v39, %v266_v40  ;;  %v721_v43 = vadd.f32 %v271_v39, %v267_v41 }
  0x9b   : > { %v724_v44 = vmul.f32 0.70710677, %v719_v42  ;;  %v727_v45 = vmul.f32 0.70710677, %v721_v43 }
  0x9d   : > { %v279_v46 = vmul.f32 %v724_v44, %v724_v44  ;;  %v319_v47 = vmul.f32 %v727_v45, %v727_v45 }
  0x9f   : > { %v280_v48 = vmin.f32 %v279_v46, 16.0  ;;  %v320_v49 = vmin.f32 %v319_v47, 16.0 }
  0xa1   : > { %v281_v50 = vmul.f32 2.1237322e-06, %v280_v48  ;;  %v292_v51 = vmul.f32 3.8918573e-05, %v280_v48  ;;  %v321_v52 = vmul.f32 2.1237322e-06, %v320_v49 }
  0xa2   : > { %v332_v53 = vmul.f32 3.8918573e-05, %v320_v49 }
  0xa3   : > { %v282_v54 = vadd.f32 0.00028619796, %v281_v50  ;;  %v293_v55 = vadd.f32 0.001143296, %v292_v51  ;;  %v322_v56 = vadd.f32 0.00028619796, %v321_v52 }
  0xa4   : > { %v333_v57 = vadd.f32 0.001143296, %v332_v53 }
  0xa5   : > { %v283_v58 = vmul.f32 %v282_v54, %v280_v48  ;;  %v294_v59 = vmul.f32 %v293_v55, %v280_v48  ;;  %v323_v60 = vmul.f32 %v322_v56, %v320_v49  ;;  %v275_v55 = vmul.f32 0.5, %v719_v42 }
  0xa6   : > { %v334_v61 = vmul.f32 %v333_v57, %v320_v49 }
  0xa7   : > { %v284_v62 = vadd.f32 0.0036580483, %v283_v58  ;;  %v295_v63 = vadd.f32 0.014752088, %v294_v59  ;;  %v324_v2 = vadd.f32 0.0036580483, %v323_v60 }
  0xa8   : > { %v335_v0 = vadd.f32 0.014752088, %v334_v61 }
  0xa9   : > { %v296_v1 = vmul.f32 %v295_v63, %v280_v48  ;;  %v285_v4 = vmul.f32 %v284_v62, %v280_v48  ;;  %v325_v8 = vmul.f32 %v324_v2, %v320_v49 }
  0xaa   : > { %v336_v3 = vmul.f32 %v335_v0, %v320_v49 }
  0xab   : > { %v297_v5 = vadd.f32 0.112945676, %v296_v1  ;;  %v286_v10 = vadd.f32 0.05243302, %v285_v4  ;;  %v326_v14 = vadd.f32 0.05243302, %v325_v8 }
  0xac   : > { %v337_v6 = vadd.f32 0.112945676, %v336_v3 }
  0xad   : > { %v298_v7 = vmul.f32 %v297_v5, %v280_v48  ;;  %v287_v16 = vmul.f32 %v286_v10, %v280_v48  ;;  %v327_v19 = vmul.f32 %v326_v14, %v320_v49 }
  0xae   : > { %v338_v9 = vmul.f32 %v337_v6, %v320_v49 }
  0xaf   : > { %v299_v11 = vadd.f32 0.4994258, %v298_v7  ;;  %v288_v20 = vadd.f32 0.18741608, %v287_v16  ;;  %v328_v21 = vadd.f32 0.18741608, %v327_v19 }
  0xb0   : > { %v339_v12 = vadd.f32 0.4994258, %v338_v9 }
  0xb1   : > { %v300_v13 = vmul.f32 %v299_v11, %v280_v48  ;;  %v289_v23 = vmul.f32 %v288_v20, %v280_v48  ;;  %v329_v26 = vmul.f32 %v328_v21, %v320_v49 }
  0xb2   : > { %v340_v15 = vmul.f32 %v339_v12, %v320_v49 }
  0xb3   : > { %v301_v17 = vadd.f32 1.0, %v300_v13  ;;  %v290_v29 = vadd.f32 1.1283791, %v289_v23  ;;  %v330_v35 = vadd.f32 1.1283791, %v329_v26 }
  0xb4   : > { %v341_v18 = vadd.f32 1.0, %v340_v15 }
  0xb5   : > { %539 = vrcp.f32 %v301_v17  ;;  %v313_v30 = vand.u32 2147483648, %v301_v17  ;;  %v311_v33 = vand.u32 2147483647, %v301_v17  ;;  %vm307_vm2 = vweird.f32 %v301_v17 }
  0xb6   : > { %541 = vrcp.f32 %v341_v18  ;;  %v353_v34 = vand.u32 2147483648, %v341_v18  ;;  %v351_v37 = vand.u32 2147483647, %v341_v18  ;;  %vm347_vm4 = vweird.f32 %v341_v18 }
  0xb7   : > { %v314_v39 = vor.u32 1.1754944e-38, %v313_v30  ;;  %v291_v41 = vmul.f32 %v290_v29, %v724_v44  ;;  %vm312_vm5 = vcmp.eq.f32.partialorder %v311_v33, 8.507059e+37  ;;  %v331_v49 = vmul.f32 %v330_v35, %v727_v45 }
  0xb8   : > { %v354_v47 = vor.u32 1.1754944e-38, %v353_v34  ;;  %vm352_vm7 = vcmp.eq.f32.partialorder %v351_v37, 8.507059e+37  ;;  %v276_v45 = vmul.f32 0.5, %v721_v43 }
  0xbb   : > { %v540_v22 = vpop.eup %539 }
  0xbc   : > { %v542_v24 = vpop.eup %541  ;;  %v303_v25 = vmul.f32 %v540_v22, %v301_v17  ;;  %vm308_vm0 = vweird.f32 %v540_v22 }
  0xbd   : > { %v343_v27 = vmul.f32 %v542_v24, %v341_v18  ;;  %vm348_vm1 = vweird.f32 %v542_v24  ;;  %vm309_vm3 = vmor %vm307_vm2, %vm308_vm0 }
  0xbe   : > { %v304_v28 = vsub.f32 1.0, %v303_v25  ;;  %vm349_vm6 = vmor %vm347_vm4, %vm348_vm1 }
  0xbf   : > { %v344_v31 = vsub.f32 1.0, %v343_v27 }
  0xc0   : > { %v305_v32 = vmul.f32 %v540_v22, %v304_v28 }
  0xc1   : > { %v345_v36 = vmul.f32 %v542_v24, %v344_v31 }
  0xc2   : > { %v306_v38 = vadd.f32 %v540_v22, %v305_v32 }
  0xc3   : > { %v346_v40 = vadd.f32 %v542_v24, %v345_v36 }
  0xc4   : > { %v310_v46 = vsel %vm309_vm3, %v540_v22, %v306_v38 }
  0xc5   : > { %v315_v48 = vsel %vm312_vm5, %v314_v39, %v310_v46  ;;  %v350_v50 = vsel %vm349_vm6, %v542_v24, %v346_v40 }
  0xc6   : > { %v316_v51 = vmul.f32 %v315_v48, %v291_v41  ;;  %v355_v52 = vsel %vm352_vm7, %v354_v47, %v350_v50 }
  0xc7   : > { %v356_v53 = vmul.f32 %v355_v52, %v331_v49 }
  0xc8   : > { %v471_v44 = vclamps-f32 %v316_v51, 1.0 }
  0xc9   : > { %v472_v54 = vclamps-f32 %v356_v53, 1.0 }
  0xca   : > { %v359_v56 = vadd.f32 1.0, %v471_v44 }
  0xcb   : > { %v360_v57 = vadd.f32 1.0, %v472_v54 }
  0xcc   : > { %v361_v58 = vmul.f32 %v359_v56, %v275_v55 }
  0xcd   : > { %v362_v59 = vmul.f32 %v360_v57, %v276_v45 }
  0xce   : > { %363 = vst [vmem:[%s188_s30] sm:$0xff] %v361_v58 }
  0xcf   : > { %364 = vst [vmem:[%s188_s30 + $0x8] sm:$0xff] %v362_v59 }
  0xd0   : > { %570 = shalt.err (!%p567_p5)
}
  0xd1   : > { %480 = dma.vmem_to_hbm [thread:$0]  (%p684_p4), %s382_s15, 256, %s384_s4, %s366_s5  }
  0xd2 PF: > { %p486_p6 = scmp.ge.s32.totalorder %s621_s17, 2  ;;  %s395_s19 = sand.u32 1, %s601_s12  }
  0xd3   : > { %s396_s21 = scalar_lea.sflag [#allocation3], %s395_s19 }
  0xd4   : > { %p483_p7 = pnand %p486_p6, %p691_p8 }
  0xd6   : > { %p484_p9 = pneg %p483_p7 }
  0xd8   : > { %596 = dma.done.wait (%p484_p9), %s396_s21, 256  }
  0xd9   : > { %598 = vsyncadd (%p484_p9), %s396_s21, 4294967040  ;;  %s16_s17 = sadd.s32 1, %s621_s17   ;;  %s784_s12 = smov %s605_s13 }
  0xda   : > { %p13_p10 = scmp.ge.s32.totalorder %s16_s17, 4   ;;  %s785_s13 = smov %s609_s14 }
  0xdb   : > { %s786_s14 = smov %s697_s25  ;;  %s787_s15 = smov %s617_s16 }
  0xdc   : > { %s788_s16 = smov %s790_s20  ;;  %15 = sbr.rel (!%p13_p10) target bundleno = 4 (0x4), region = 70 }
  0xe1   :  { %402 = vsyncpa [#allocation3], 1 }
  0xe2   :  { %404 = vsyncpa [#allocation3 + $0x1], 1 }

</bundles_post_ra>
